<compile_context>
chip_gen: v5e
topology: v5e:2x2
jax: 0.10.0
libtpu: 0.0.40
codegen_flags: <defaults>
</compile_context>

<pallas_src>
import math

import jax
import jax.numpy as jnp
from jax import lax
from jax.experimental import pallas as pl
from jax.experimental.pallas import tpu as pltpu

_EPS = 1e-12  # matches torch F.normalize default eps (clamps the norm)

_VMEM_LIMIT_BYTES = 48 * 1024 * 1024
_TILE_BUDGET_BYTES = 36 * 1024 * 1024  # double-buffered tiles must fit here


def _round_up(v, m):
    return ((v + m - 1) // m) * m


# ---------------------------------------------------------------------------
# Kernels: pure MXU matmul + per-output-column scale (everything else hoisted).
# ---------------------------------------------------------------------------
def _cosine_linear_train_kernel(sigma_ref, x_ref, w_ref, invw_ref, wo_ref, ws_ref):
    sigma = sigma_ref[0]                      # scalar SMEM read, off the store path
    # (TB, K) x (TN, K) contracted over K -- no explicit transpose of W.
    out = lax.dot_general(
        x_ref[...], w_ref[...],
        dimension_numbers=(((1,), (1,)), ((), ())),
        preferred_element_type=jnp.float32)   # (TB, TN) f32
    tmp = out * invw_ref[...]                 # fold 1/||w_row|| into columns
    wo_ref[...] = tmp.astype(wo_ref.dtype)            # 'wosigma'
    ws_ref[...] = (tmp * sigma).astype(ws_ref.dtype)  # 'wsigma'


def _cosine_linear_eval_kernel(sigma_ref, x_ref, w_ref, invw_ref, ws_ref):
    sigma = sigma_ref[0]
    out = lax.dot_general(
        x_ref[...], w_ref[...],
        dimension_numbers=(((1,), (1,)), ((), ())),
        preferred_element_type=jnp.float32)
    ws_ref[...] = (out * (invw_ref[...] * sigma)).astype(ws_ref.dtype)


# ---------------------------------------------------------------------------
# Tiling helpers.
# ---------------------------------------------------------------------------
def _tile_bytes(tb, tn, k_pad, n_out):
    # Double-buffered: bf16 x tile + bf16 W tile + f32 invw tile + f32 outputs.
    return 2 * (tb * k_pad * 2 + tn * k_pad * 2 + tn * 4 + n_out * tb * tn * 4)


def _pick_tn(n):
    n128 = _round_up(n, 128)
    cands = {128, 256, 512}
    if n128 <= 512:
        cands.add(n128)
    best_t, best_key = None, None
    for t in sorted(cands):
        waste = _round_up(n, t) - n
        key = (waste, -t)              # minimize padding waste, then prefer bigger
        if best_key is None or key < best_key:
            best_t, best_key = t, key
    return best_t


def _pick_tb(b, tn, k_pad, n_out):
    b_full = _round_up(b, 8)
    if _tile_bytes(b_full, tn, k_pad, n_out) <= _TILE_BUDGET_BYTES:
        return b_full                  # whole batch resident -> W streams once
    best_t, best_key = None, None
    for t in (128, 256, 512):
        if _tile_bytes(t, tn, k_pad, n_out) > _TILE_BUDGET_BYTES:
            continue
        waste = _round_up(b, t) - b
        key = (waste, -t)
        if best_key is None or key < best_key:
            best_t, best_key = t, key
    if best_t is None:
        # TODO(synk): very large in_features need a K grid axis ("arbitrary")
        # with an f32 VMEM accumulator; LUCIR feature dims fit whole-K tiles.
        return 8
    return best_t


# ---------------------------------------------------------------------------
# Wrapper.
# ---------------------------------------------------------------------------
def cosine_linear(x, weight, sigma, *, training=False):
    """Pallas implementation of CosineLinear.forward.

    x:      (B, in_features) float32
    weight: (out_features, in_features) float32
    sigma:  (1,) float32 or None
    """
    B, K = x.shape
    N, Kw = weight.shape
    assert K == Kw, "x / weight in_features mismatch"

    sigma_arr = (jnp.ones((1,), jnp.float32) if sigma is None
                 else jnp.asarray(sigma, jnp.float32).reshape((1,)))

    # ---- one-time (per call) precompute, hoisted out of the grid -----------
    eps2 = jnp.float32(_EPS * _EPS)
    x32 = x.astype(jnp.float32)
    inv_xn = lax.rsqrt(jnp.maximum(jnp.sum(x32 * x32, axis=1, keepdims=True), eps2))
    x_n = (x32 * inv_xn).astype(jnp.bfloat16)                     # (B, K) bf16

    w32 = weight.astype(jnp.float32)
    inv_wn = lax.rsqrt(jnp.maximum(jnp.sum(w32 * w32, axis=1), eps2))  # (N,) f32
    w_bf = weight.astype(jnp.bfloat16)                             # (N, K) bf16

    # ---- tiling -------------------------------------------------------------
    n_out = 2 if training else 1
    K_pad = _round_up(K, 128)
    TN = _pick_tn(N)
    TB = _pick_tb(B, TN, K_pad, n_out)
    B_pad = _round_up(B, TB)
    N_pad = _round_up(N, TN)
    grid_b = B_pad // TB
    grid_n = N_pad // TN

    # Give a second TensorCore (v7x) work when the grid would collapse to 1.
    if grid_b == 1 and grid_n == 1 and TN >= 256 and TN % 256 == 0:
        TN //= 2
        grid_n = N_pad // TN

    # ---- padding (zero padding is exactly benign: padded inv_wn entries = 0)
    x_p = x_n if (B_pad == B and K_pad == K) else jnp.pad(
        x_n, ((0, B_pad - B), (0, K_pad - K)))
    w_p = w_bf if (N_pad == N and K_pad == K) else jnp.pad(
        w_bf, ((0, N_pad - N), (0, K_pad - K)))
    invw_p = (inv_wn if N_pad == N else jnp.pad(inv_wn, (0, N_pad - N))).reshape(1, N_pad)

    # ---- grid order: keep the operand with the larger re-read cost resident.
    w_reread = (grid_b - 1) * N_pad * K_pad    # bytes-ish re-read of W if batch outer
    x_reread = (grid_n - 1) * B_pad * K_pad    # bytes-ish re-read of x if N outer
    batch_outer = w_reread <= x_reread

    if batch_outer:
        grid = (grid_b, grid_n)
        x_map = lambda i, j, s: (i, 0)
        w_map = lambda i, j, s: (j, 0)
        iw_map = lambda i, j, s: (0, j)
        o_map = lambda i, j, s: (i, j)
        bytes_in = 2 * (B_pad * K_pad + grid_b * N_pad * K_pad)
    else:
        grid = (grid_n, grid_b)
        x_map = lambda j, i, s: (i, 0)
        w_map = lambda j, i, s: (j, 0)
        iw_map = lambda j, i, s: (0, j)
        o_map = lambda j, i, s: (i, j)
        bytes_in = 2 * (grid_n * B_pad * K_pad + N_pad * K_pad)

    in_specs = [
        pl.BlockSpec((TB, K_pad), x_map),    # bf16 normalized-x tile
        pl.BlockSpec((TN, K_pad), w_map),    # bf16 W tile, (out, in) layout
        pl.BlockSpec((1, TN), iw_map),       # f32 1/||w_row|| slice
    ]
    out_spec = pl.BlockSpec((TB, TN), o_map)

    cost = pl.CostEstimate(
        flops=2 * B_pad * N_pad * K_pad,
        transcendentals=0,
        bytes_accessed=int(bytes_in + 4 * N_pad + 4 * n_out * B_pad * N_pad),
    )
    compiler_params = pltpu.CompilerParams(
        dimension_semantics=("parallel", "parallel"),
        vmem_limit_bytes=_VMEM_LIMIT_BYTES,
    )

    if training:
        wo, ws = pl.pallas_call(
            _cosine_linear_train_kernel,
            out_shape=(jax.ShapeDtypeStruct((B_pad, N_pad), jnp.float32),   # wosigma
                       jax.ShapeDtypeStruct((B_pad, N_pad), jnp.float32)),  # wsigma
            grid_spec=pltpu.PrefetchScalarGridSpec(
                num_scalar_prefetch=1, grid=grid,
                in_specs=in_specs, out_specs=(out_spec, out_spec)),
            compiler_params=compiler_params,
            cost_estimate=cost,
        )(sigma_arr, x_p, w_p, invw_p)
        return {'wsigma': ws[:B, :N], 'wosigma': wo[:B, :N]}

    ws = pl.pallas_call(
        _cosine_linear_eval_kernel,
        out_shape=jax.ShapeDtypeStruct((B_pad, N_pad), jnp.float32),
        grid_spec=pltpu.PrefetchScalarGridSpec(
            num_scalar_prefetch=1, grid=grid,
            in_specs=in_specs, out_specs=out_spec),
        compiler_params=compiler_params,
        cost_estimate=cost,
    )(sigma_arr, x_p, w_p, invw_p)
    return ws[:B, :N]


def init_cosine_linear_params(key, in_features, out_features, use_sigma=True):
    # Matches reset_parameters(): weight ~ U(-stdv, stdv), sigma = 1.
    stdv = 1.0 / math.sqrt(in_features)
    weight = jax.random.uniform(
        key, (out_features, in_features), jnp.float32, minval=-stdv, maxval=stdv)
    sigma = jnp.ones((1,), jnp.float32) if use_sigma else None
    return weight, sigma


if __name__ == "__main__":
    key = jax.random.PRNGKey(0)
    k_x, k_w, k_x2, k_w2 = jax.random.split(key, 4)

    def ref(x, w, s):
        xn = x / jnp.maximum(jnp.linalg.norm(x, axis=1, keepdims=True), _EPS)
        wn = w / jnp.maximum(jnp.linalg.norm(w, axis=1, keepdims=True), _EPS)
        o = xn @ wn.T
        return o, (s[0] if s is not None else 1.0) * o

    # bf16 MXU inputs with f32 accumulation -> slightly looser tolerance than pure f32.
    tol = dict(atol=2e-2, rtol=2e-2)

    # --- small shapes matching the module's forward ---
    batch, in_features, out_features = 8, 32, 16
    x = jax.random.normal(k_x, (batch, in_features), jnp.float32)
    weight, sigma = init_cosine_linear_params(k_w, in_features, out_features, use_sigma=True)
    sigma = sigma * 2.5  # make the sigma scaling observable

    y = cosine_linear(x, weight, sigma, training=False)           # eval: sigma-scaled only
    jax.block_until_ready(y)
    outs = cosine_linear(x, weight, sigma, training=True)         # training: both outputs
    jax.block_until_ready(outs['wsigma'])
    jax.block_until_ready(outs['wosigma'])

    ref_o, ref_os = ref(x, weight, sigma)
    assert jnp.allclose(outs['wosigma'], ref_o, **tol)
    assert jnp.allclose(outs['wsigma'], ref_os, **tol)
    assert jnp.allclose(y, ref_os, **tol)

    # --- a multi-tile / padding case (awkward sizes for class counts) ---
    b2, k2, n2 = 384, 192, 320
    x2 = jax.random.normal(k_x2, (b2, k2), jnp.float32)
    w2, s2 = init_cosine_linear_params(k_w2, k2, n2, use_sigma=True)
    y2 = cosine_linear(x2, w2, s2, training=False)
    jax.block_until_ready(y2)
    outs2 = cosine_linear(x2, w2, s2, training=True)
    jax.block_until_ready(outs2['wsigma'])
    r2_o, r2_os = ref(x2, w2, s2)
    assert jnp.allclose(y2, r2_os, **tol)
    assert jnp.allclose(outs2['wosigma'], r2_o, **tol)
    assert jnp.allclose(outs2['wsigma'], r2_os, **tol)

    # --- sigma=None path ---
    y3 = cosine_linear(x, weight, None, training=False)
    jax.block_until_ready(y3)
    assert jnp.allclose(y3, ref_o, **tol)

    print("KERNEL_OK")
</pallas_src>

<mosaic_0001>
module attributes {stable_mosaic.version = 11 : i64} {
  func.func @_cosine_linear_eval_kernel(%arg0: i32, %arg1: i32, %arg2: memref<1xf32, #tpu.memory_space<smem>>, %arg3: memref<8x128xbf16, #tpu.memory_space<vmem>>, %arg4: memref<128x128xbf16, #tpu.memory_space<vmem>>, %arg5: memref<1x128xf32, #tpu.memory_space<vmem>>, %arg6: memref<8x128xf32, #tpu.memory_space<vmem>>) attributes {dimension_semantics = [#tpu.dimension_semantics<parallel>, #tpu.dimension_semantics<parallel>], iteration_bounds = array<i64: 1, 1>, scalar_prefetch = 1 : i64, scratch_operands = 0 : i64, tpu.core_type = #tpu.core_type<tc>, window_params = [{transform_indices = @transform_0, window_bounds = array<i64: 8, 128>}, {transform_indices = @transform_1, window_bounds = array<i64: 128, 128>}, {transform_indices = @transform_2, window_bounds = array<i64: 1, 128>}, {transform_indices = @transform_3, window_bounds = array<i64: 8, 128>}]} {
    %c0 = arith.constant 0 : index
    %0 = memref.load %arg2[%c0] : memref<1xf32, #tpu.memory_space<smem>>
    %c0_0 = arith.constant 0 : index
    %c0_1 = arith.constant 0 : index
    %1 = vector.load %arg3[%c0_0, %c0_1] : memref<8x128xbf16, #tpu.memory_space<vmem>>, vector<8x128xbf16>
    %c0_2 = arith.constant 0 : index
    %c0_3 = arith.constant 0 : index
    %2 = vector.load %arg4[%c0_2, %c0_3] : memref<128x128xbf16, #tpu.memory_space<vmem>>, vector<128x128xbf16>
    %cst = arith.constant dense<0.000000e+00> : vector<8x128xf32>
    %3 = tpu.matmul %1, %2, %cst {dimension_numbers = #tpu.dot_dimension_numbers<[1], [1], [0], [0], [0, 0, 1, 0], [], []>} : vector<8x128xbf16>, vector<128x128xbf16>, vector<8x128xf32> -> vector<8x128xf32>
    %c0_4 = arith.constant 0 : index
    %c0_5 = arith.constant 0 : index
    %4 = vector.load %arg5[%c0_4, %c0_5] : memref<1x128xf32, #tpu.memory_space<vmem>>, vector<1x128xf32>
    %5 = vector.broadcast %0 : f32 to vector<1x128xf32>
    %6 = arith.mulf %4, %5 : vector<1x128xf32>
    %7 = vector.broadcast %6 : vector<1x128xf32> to vector<8x128xf32>
    %8 = arith.mulf %3, %7 : vector<8x128xf32>
    %c0_6 = arith.constant 0 : index
    %c0_7 = arith.constant 0 : index
    %9 = vector.load %arg6[%c0_6, %c0_7] : memref<8x128xf32, #tpu.memory_space<vmem>>, vector<8x128xf32>
    tpu.vector_store %arg6[%c0_6, %c0_7], %8 {strides = array<i32>} : memref<8x128xf32, #tpu.memory_space<vmem>>, vector<8x128xf32>,
    return
  }
  func.func @transform_0(%arg0: i32, %arg1: i32, %arg2: memref<1xf32, #tpu.memory_space<smem>>) -> (i32, i32) {
    %c0_i32 = arith.constant 0 : i32
    %c0_i32_0 = arith.constant 0 : i32
    return %arg0, %c0_i32 : i32, i32
  }
  func.func @transform_1(%arg0: i32, %arg1: i32, %arg2: memref<1xf32, #tpu.memory_space<smem>>) -> (i32, i32) {
    %c0_i32 = arith.constant 0 : i32
    %c0_i32_0 = arith.constant 0 : i32
    return %arg1, %c0_i32 : i32, i32
  }
  func.func @transform_2(%arg0: i32, %arg1: i32, %arg2: memref<1xf32, #tpu.memory_space<smem>>) -> (i32, i32) {
    %c0_i32 = arith.constant 0 : i32
    %c0_i32_0 = arith.constant 0 : i32
    return %c0_i32, %arg1 : i32, i32
  }
  func.func @transform_3(%arg0: i32, %arg1: i32, %arg2: memref<1xf32, #tpu.memory_space<smem>>) -> (i32, i32) {
    %c0_i32 = arith.constant 0 : i32
    return %arg0, %arg1 : i32, i32
  }
}

</mosaic_0001>

<bundles_post_ra>
// kernel: tpu_custom_call.1
= control target key start
LH: loop header
LB: loop body
LE: loop exit
PB: predicated region body
PF: predicated region fallthrough
CT: control target
= control target key end

     0   :  { %10 = vsyncpa [#allocation5], 0  ;;  %s320_s0 = inlined_call_operand.<no memory space> [shape: f32[1], index: 0, kind: input, shape index: {}]   ;;  %s321_s1 = inlined_call_operand.hbm [shape: bf16[8,128], index: 1, kind: input, shape index: {}]   ;;  %s322_s2 = inlined_call_operand.hbm [shape: bf16[128,128], index: 2, kind: input, shape index: {}]   ;;  %s323_s3 = inlined_call_operand.vmem [shape: f32[1,128], index: 3, kind: input, shape index: {}]   ;;  %s324_s4 = inlined_call_operand.hbm [shape: f32[8,128], index: 4, kind: output, shape index: {}]  }
   0x1   :  { %11 = vsyncpa [#allocation8], 0 }
   0x2   :  { %12 = vsyncpa [#allocation6], 0  ;;  %s18_s17 = sshll.u32 %s321_s1, 4  ;;  %s275_s18 = smov [#allocation4]   ;;  %s19_s17 = int_to_ptr.hbm [resolvable:$true] %s18_s17 }
   0x3   :  { %s20_s19 = sshll.u32 %s275_s18, 4  ;;  %s28_s22 = sshll.u32 %s322_s2, 4  ;;  %s21_s19 = int_to_ptr.vmem [resolvable:$true] %s20_s19  ;;  %s29_s22 = int_to_ptr.hbm [resolvable:$true] %s28_s22 }
   0x4   :  { %23 = dma.hbm_to_vmem [thread:$0]  %s19_s17, 64, %s21_s19, [#allocation5]  }
   0x5   :  { %s276_s23 = smov [#allocation7]   ;;  %s277_s25 = smov 64  }
   0x6   :  { %s30_s24 = sshll.u32 %s276_s23, 4  ;;  %s278_s26 = smov 4   ;;  %s31_s24 = int_to_ptr.vmem [resolvable:$true] %s30_s24 }
   0x7   :  { %36 = dma.hbm_to_vmem [thread:$0]  %s29_s22, 1024, %s31_s24, [#allocation8], %s277_s25, %s277_s25, %s278_s26  }
   0x8   :  { %269 = dma.done.wait [#allocation5], 64  }
   0x9   :  { %270 = vsyncadd [#allocation5], 4294967232 }
   0xa   :  { %271 = dma.done.wait [#allocation8], 1024  }
   0xb   :  { %272 = vsyncadd [#allocation8], 4294966272  ;;  %v191_v0 = vld [vmem:[#allocation7 + $0x38] sm:$0xff]  ;;  %v190_v1 = vld [vmem:[#allocation7 + $0x30] sm:$0xff]  ;;  %v127_v10 = vstv %s320_s0  ;;  %s279_s29 = smov [#allocation9]   ;;  %s141_s7 = sshll.u32 %s324_s4, 4  ;;  %s142_s7 = int_to_ptr.hbm [resolvable:$true] %s141_s7 }
   0xc   :  { %113 = vmatpush.bf16.xpose.msra.mxu0 %v191_v0  ;;  %v189_v2 = vld [vmem:[#allocation7 + $0x28] sm:$0xff]  ;;  %v188_v3 = vld [vmem:[#allocation7 + $0x20] sm:$0xff]  ;;  %v187_v4 = vld [vmem:[#allocation7 + $0x18] sm:$0xff]  ;;  %s139_s30 = sshll.u32 %s279_s29, 4  ;;  %s140_s30 = int_to_ptr.vmem [resolvable:$true] %s139_s30 }
   0xd   :  { %v186_v5 = vld [vmem:[#allocation7 + $0x10] sm:$0xff]  ;;  %v185_v6 = vld [vmem:[#allocation7 + $0x8] sm:$0xff]  ;;  %v184_v7 = vld [vmem:[#allocation7] sm:$0xff] }
   0xe   :  { %v48_v8 = vld [vmem:[#allocation4] sm:$0xf] }
   0xf   :  { %v126_v9 = vld [vmem:[%s323_s3] sm:$0x1] }
  0x10   :  { %v128_v11 = vmul.f32 %v127_v10, %v126_v9 }
  0x12   :  { %v130_v12 = vperm.slane %v128_v11, 0 }
  0x14   :  { %114 = vmatpush.bf16.xpose.msra.mxu0 %v190_v1 }
  0x1c   :  { %115 = vmatpush.bf16.xpose.msra.mxu0 %v189_v2 }
  0x24   :  { %116 = vmatpush.bf16.xpose.msra.mxu0 %v188_v3 }
  0x2c   :  { %117 = vmatpush.bf16.xpose.msra.mxu0 %v187_v4 }
  0x34   :  { %118 = vmatpush.bf16.xpose.msra.mxu0 %v186_v5 }
  0x3c   :  { %119 = vmatpush.bf16.xpose.msra.mxu0 %v185_v6 }
  0x44   :  { %120 = vmatpush.bf16.xpose.msra.mxu0 %v184_v7 }
  0x4b   :  { %121 = vmatmul.bf16.vlgmr.msra.gmra.mxu0 %v48_v8 }
  0xc8   :  { %v122_v13 = vpop.f32.mrf.mxu0 }
  0xc9   :  { %v132_v14 = vmul.f32 %v130_v12, %v122_v13 }
  0xcb   :  { %133 = vst [vmem:[#allocation9] sm:$0xff] %v132_v14 }
  0xcc   :  { %144 = dma.vmem_to_hbm [thread:$0]  %s140_s30, 128, %s142_s7, [#allocation6]  }
  0xd0   :  { %v124_v15 = vpop.f32.mrf.mxu0 }
  0xd1   :  { %273 = dma.done.wait [#allocation6], 128  }
  0xd2   :  { %274 = vsyncadd [#allocation6], 4294967168 }
  0xd3   :  { %149 = vsyncpa [#allocation5], 1 }
  0xd4   :  { %150 = vsyncpa [#allocation8], 1 }
  0xd5   :  { %151 = vsyncpa [#allocation6], 1 }

</bundles_post_ra>
